<compile_context>
chip_gen: v7x
topology: tpu7x:2x2x1
jax: 0.10.0
libtpu: 0.0.40
codegen_flags: <defaults>
</compile_context>

<pallas_src>
import math

import jax
import jax.numpy as jnp
from jax.experimental import pallas as pl
from jax.experimental.pallas import tpu as pltpu

HIDDEN = 64              # logical hidden width (nn.Linear(input_size, 64))
HIDDEN_PAD = 128         # zero-padded to one full 128-lane vreg
TB_MAX = 1024            # max batch-tile rows per grid step
ROW_CHUNK = 128          # in-kernel sub-block (rows) for matmul + epilogue
PALLAS_MIN_BATCH = 512   # below this, plain XLA wins (launch/step overhead)
_VMEM_X_BUDGET = 12 * 1024 * 1024   # bytes allowed for the double-buffered x tile


def _cdiv(a, b):
    return (a + b - 1) // b


def _round_up(n, m):
    return ((n + m - 1) // m) * m


def _choose_tile(B, F):
    """Pick (tile_rows, num_tiles): rows a multiple of 128 (lane-dense output),
    balanced so padding waste < one 128-row group per tile, VMEM-safe for large F,
    and >= 2 (preferably even) tiles so v7x can shard across both TensorCores."""
    f_pad = _round_up(max(F, 1), 128)                       # lane-padded x row footprint
    tb_cap = (_VMEM_X_BUDGET // (2 * 4 * f_pad)) // ROW_CHUNK * ROW_CHUNK
    tb_cap = max(ROW_CHUNK, min(TB_MAX, tb_cap))
    n_tiles = _cdiv(B, tb_cap)
    if n_tiles == 1 and B > ROW_CHUNK:
        n_tiles = 2                                         # keep both v7x TCs busy
    elif n_tiles > 2 and n_tiles % 2 == 1:
        n_tiles += 1                                        # prefer even tile counts
    tb = min(tb_cap, _round_up(_cdiv(B, n_tiles), ROW_CHUNK))
    n_tiles = _cdiv(B, tb)
    return tb, n_tiles


def attack_kernel(x_ref, w1_ref, b1_ref, w2_ref, b2_ref, o_ref):
    """One batch tile.  x_ref: (tb, F), w1_ref: (F, 128) bf16,
    b1/w2: (1, 128) f32, b2: (1, 1) f32, o_ref: (1, tb) f32 (lane-dense)."""
    tb = x_ref.shape[0]
    # Statically-unrolled 128-row chunks: keeps the (rows,128) f32 intermediates
    # small (~16 vregs) and overlaps MXU work with the VPU/XLU epilogue.
    for c in range(tb // ROW_CHUNK):
        r0 = c * ROW_CHUNK
        xs = x_ref[pl.ds(r0, ROW_CHUNK), :].astype(jnp.bfloat16)
        # Layer 1 on the MXU: bf16 operands, f32 accumulation.
        h = jnp.dot(xs, w1_ref[...], preferred_element_type=jnp.float32)
        h = jnp.maximum(h + b1_ref[...], 0.0)
        # Layer 2 (out_features == 1): VPU multiply + lane (XLU) reduction,
        # relayouted to a lane-dense (1, ROW_CHUNK) row for sigmoid + dense store.
        z = jnp.sum(h * w2_ref[...], axis=-1).reshape(1, ROW_CHUNK)
        o_ref[:, pl.ds(r0, ROW_CHUNK)] = jax.nn.sigmoid(z + b2_ref[...])


def _xla_forward(x, w1, b1, w2_row, b2):
    """Plain-XLA reference / small-batch fallback (f32)."""
    h = jnp.maximum(jnp.dot(x, w1) + b1, 0.0)
    return jax.nn.sigmoid(jnp.sum(h * w2_row, axis=-1, keepdims=True) + b2)


def attack_forward(x, w1, b1, w2_row, b2, *, use_pallas=None):
    """x: (B, input_size) -> (B, 1) f32 membership score.

    w1: (input_size, HIDDEN_PAD), b1/w2_row: (1, HIDDEN_PAD), b2: (1, 1);
    hidden entries >= HIDDEN are zero (padding).
    """
    B, F = x.shape
    H = w1.shape[1]

    if use_pallas is None:
        use_pallas = B >= PALLAS_MIN_BATCH
    if not use_pallas:
        # One small grid step cannot amortize launch overhead -> fused XLA path.
        return _xla_forward(x.astype(jnp.float32), w1.astype(jnp.float32), b1, w2_row, b2)

    tb, n_tiles = _choose_tile(B, F)
    b_pad = tb * n_tiles
    if b_pad != B:
        x = jnp.pad(x, ((0, b_pad - B), (0, 0)))

    w1_bf16 = w1.astype(jnp.bfloat16)   # bf16 MXU operand, f32 accumulation in-kernel

    cost = pl.CostEstimate(
        flops=2 * b_pad * F * H + 4 * b_pad * H,
        transcendentals=b_pad,
        bytes_accessed=b_pad * F * x.dtype.itemsize + b_pad * 4
        + F * H * 2 + 2 * H * 4 + 4,
    )

    out = pl.pallas_call(
        attack_kernel,
        out_shape=jax.ShapeDtypeStruct((1, b_pad), jnp.float32),
        grid=(n_tiles,),
        in_specs=[
            pl.BlockSpec((tb, F), lambda i: (i, 0)),   # x: streamed per tile
            pl.BlockSpec((F, H), lambda i: (0, 0)),    # w1 (bf16): VMEM-resident
            pl.BlockSpec((1, H), lambda i: (0, 0)),    # b1: resident
            pl.BlockSpec((1, H), lambda i: (0, 0)),    # w2 row: resident
            pl.BlockSpec((1, 1), lambda i: (0, 0)),    # b2: resident
        ],
        out_specs=pl.BlockSpec((1, tb), lambda i: (0, i)),   # lane-dense output row
        compiler_params=pltpu.CompilerParams(
            dimension_semantics=("parallel",),
        ),
        cost_estimate=cost,
    )(x, w1_bf16, b1, w2_row, b2)
    return out[0, :B].reshape(B, 1)


def init_params(key, input_size, hidden=HIDDEN, hidden_pad=HIDDEN_PAD):
    """nn.Linear default init (U[-1/sqrt(fan_in), 1/sqrt(fan_in)]), hidden zero-padded."""
    k1, k2, k3, k4 = jax.random.split(key, 4)
    bound1 = 1.0 / math.sqrt(input_size)
    bound2 = 1.0 / math.sqrt(hidden)
    w1 = jax.random.uniform(k1, (input_size, hidden), jnp.float32, -bound1, bound1)
    b1 = jax.random.uniform(k2, (1, hidden), jnp.float32, -bound1, bound1)
    w2 = jax.random.uniform(k3, (1, hidden), jnp.float32, -bound2, bound2)
    b2 = jax.random.uniform(k4, (1, 1), jnp.float32, -bound2, bound2)
    pad = hidden_pad - hidden
    w1 = jnp.pad(w1, ((0, 0), (0, pad)))
    b1 = jnp.pad(b1, ((0, 0), (0, pad)))
    w2 = jnp.pad(w2, ((0, 0), (0, pad)))
    return w1, b1, w2, b2


if __name__ == "__main__":
    key = jax.random.PRNGKey(0)
    k_x, k_p, k_x2 = jax.random.split(key, 3)

    # FMNIST attack-model input = 10-class posterior vector per sample.
    input_size = 10
    params = init_params(k_p, input_size)

    # Small batch, forced through the Pallas kernel (single 128-row tile).
    batch = 8
    x = jax.nn.softmax(jax.random.normal(k_x, (batch, input_size), jnp.float32), axis=-1)
    out = jax.block_until_ready(attack_forward(x, *params, use_pallas=True))
    ref = _xla_forward(x, *params)
    assert out.shape == (batch, 1)
    assert jnp.allclose(out, ref, atol=2e-2), "mismatch vs reference (small batch, pallas)"

    # Small batch via auto dispatch -> plain-XLA fallback (tight tolerance).
    out_auto = jax.block_until_ready(attack_forward(x, *params))
    assert jnp.allclose(out_auto, ref, atol=1e-6), "mismatch vs reference (xla fallback)"

    # Larger non-divisible batch: balanced, even-count multi-tile Pallas path.
    batch2 = 2500
    x2 = jax.nn.softmax(jax.random.normal(k_x2, (batch2, input_size), jnp.float32), axis=-1)
    out2 = jax.block_until_ready(attack_forward(x2, *params))
    ref2 = _xla_forward(x2, *params)
    assert out2.shape == (batch2, 1)
    assert jnp.allclose(out2, ref2, atol=2e-2), "mismatch vs reference (large batch)"

    print("KERNEL_OK")
</pallas_src>

<mosaic_0001>
module attributes {stable_mosaic.version = 11 : i64} {
  func.func @attack_kernel(%arg0: i32, %arg1: memref<128x10xf32, #tpu.memory_space<vmem>>, %arg2: memref<10x128xbf16, #tpu.memory_space<vmem>>, %arg3: memref<1x128xf32, #tpu.memory_space<vmem>>, %arg4: memref<1x128xf32, #tpu.memory_space<vmem>>, %arg5: memref<1x1xf32, #tpu.memory_space<vmem>>, %arg6: memref<1x128xf32, #tpu.memory_space<vmem>>) attributes {dimension_semantics = [#tpu.dimension_semantics<parallel>], iteration_bounds = array<i64: 1>, scalar_prefetch = 0 : i64, scratch_operands = 0 : i64, tpu.core_type = #tpu.core_type<tc>, window_params = [{transform_indices = @transform_0, window_bounds = array<i64: 128, 10>}, {pipeline_mode = #tpu.pipeline_mode<synchronous>, transform_indices = @transform_1, window_bounds = array<i64: 10, 128>}, {pipeline_mode = #tpu.pipeline_mode<synchronous>, transform_indices = @transform_2, window_bounds = array<i64: 1, 128>}, {pipeline_mode = #tpu.pipeline_mode<synchronous>, transform_indices = @transform_3, window_bounds = array<i64: 1, 128>}, {pipeline_mode = #tpu.pipeline_mode<synchronous>, transform_indices = @transform_4, window_bounds = array<i64: 1, 1>}, {transform_indices = @transform_5, window_bounds = array<i64: 1, 128>}]} {
    %c0 = arith.constant 0 : index
    %c0_0 = arith.constant 0 : index
    %0 = vector.load %arg1[%c0, %c0_0] : memref<128x10xf32, #tpu.memory_space<vmem>>, vector<128x10xf32>
    %1 = arith.truncf %0 : vector<128x10xf32> to vector<128x10xbf16>
    %c0_1 = arith.constant 0 : index
    %c0_2 = arith.constant 0 : index
    %2 = vector.load %arg2[%c0_1, %c0_2] : memref<10x128xbf16, #tpu.memory_space<vmem>>, vector<10x128xbf16>
    %cst = arith.constant dense<0.000000e+00> : vector<128x128xf32>
    %3 = tpu.matmul %1, %2, %cst {dimension_numbers = #tpu.dot_dimension_numbers<[1], [0], [0], [1], [0, 0, 1, 1], [], []>} : vector<128x10xbf16>, vector<10x128xbf16>, vector<128x128xf32> -> vector<128x128xf32>
    %c0_3 = arith.constant 0 : index
    %c0_4 = arith.constant 0 : index
    %4 = vector.load %arg3[%c0_3, %c0_4] : memref<1x128xf32, #tpu.memory_space<vmem>>, vector<1x128xf32>
    %5 = vector.broadcast %4 : vector<1x128xf32> to vector<128x128xf32>
    %6 = arith.addf %3, %5 : vector<128x128xf32>
    %cst_5 = arith.constant 0.000000e+00 : f32
    %7 = vector.broadcast %cst_5 : f32 to vector<128x128xf32>
    %8 = arith.maximumf %6, %7 : vector<128x128xf32>
    %c0_6 = arith.constant 0 : index
    %c0_7 = arith.constant 0 : index
    %9 = vector.load %arg4[%c0_6, %c0_7] : memref<1x128xf32, #tpu.memory_space<vmem>>, vector<1x128xf32>
    %10 = vector.broadcast %9 : vector<1x128xf32> to vector<128x128xf32>
    %11 = arith.mulf %8, %10 : vector<128x128xf32>
    %cst_8 = arith.constant dense<0.000000e+00> : vector<128xf32>
    %12 = vector.multi_reduction <add>, %11, %cst_8 [1] : vector<128x128xf32> to vector<128xf32>
    %13 = vector.shape_cast %12 : vector<128xf32> to vector<1x128xf32>
    %c0_9 = arith.constant 0 : index
    %c0_10 = arith.constant 0 : index
    %14 = vector.load %arg5[%c0_9, %c0_10] : memref<1x1xf32, #tpu.memory_space<vmem>>, vector<1x1xf32>
    %15 = vector.broadcast %14 : vector<1x1xf32> to vector<1x128xf32>
    %16 = arith.addf %13, %15 : vector<1x128xf32>
    %17 = arith.negf %16 : vector<1x128xf32>
    %18 = math.exp %17 : vector<1x128xf32>
    %cst_11 = arith.constant 1.000000e+00 : f32
    %19 = vector.broadcast %cst_11 : f32 to vector<1x128xf32>
    %20 = arith.addf %19, %18 : vector<1x128xf32>
    %21 = arith.divf %19, %20 : vector<1x128xf32>
    %c0_12 = arith.constant 0 : index
    %c0_13 = arith.constant 0 : index
    %22 = vector.load %arg6[%c0_12, %c0_13] : memref<1x128xf32, #tpu.memory_space<vmem>>, vector<1x128xf32>
    tpu.vector_store %arg6[%c0_12, %c0_13], %21 {strides = array<i32>} : memref<1x128xf32, #tpu.memory_space<vmem>>, vector<1x128xf32>,
    return
  }
  func.func @transform_0(%arg0: i32) -> (i32, i32) {
    %c0_i32 = arith.constant 0 : i32
    %c0_i32_0 = arith.constant 0 : i32
    return %arg0, %c0_i32 : i32, i32
  }
  func.func @transform_1(%arg0: i32) -> (i32, i32) {
    %c0_i32 = arith.constant 0 : i32
    %c0_i32_0 = arith.constant 0 : i32
    %c0_i32_1 = arith.constant 0 : i32
    return %c0_i32, %c0_i32_0 : i32, i32
  }
  func.func @transform_2(%arg0: i32) -> (i32, i32) {
    %c0_i32 = arith.constant 0 : i32
    %c0_i32_0 = arith.constant 0 : i32
    %c0_i32_1 = arith.constant 0 : i32
    return %c0_i32, %c0_i32_0 : i32, i32
  }
  func.func @transform_3(%arg0: i32) -> (i32, i32) {
    %c0_i32 = arith.constant 0 : i32
    %c0_i32_0 = arith.constant 0 : i32
    %c0_i32_1 = arith.constant 0 : i32
    return %c0_i32, %c0_i32_0 : i32, i32
  }
  func.func @transform_4(%arg0: i32) -> (i32, i32) {
    %c0_i32 = arith.constant 0 : i32
    %c0_i32_0 = arith.constant 0 : i32
    %c0_i32_1 = arith.constant 0 : i32
    return %c0_i32, %c0_i32_0 : i32, i32
  }
  func.func @transform_5(%arg0: i32) -> (i32, i32) {
    %c0_i32 = arith.constant 0 : i32
    %c0_i32_0 = arith.constant 0 : i32
    return %c0_i32, %arg0 : i32, i32
  }
}

</mosaic_0001>

<bundles_post_ra>
// kernel: tpu_custom_call.1
= control target key start
LH: loop header
LB: loop body
LE: loop exit
PB: predicated region body
PF: predicated region fallthrough
CT: control target
= control target key end

     0   :  { %s878_s0 = inlined_call_operand.vmem [shape: f32[128,10], index: 0, kind: input, shape index: {}]   ;;  %s879_s1 = inlined_call_operand.vmem [shape: bf16[10,128], index: 1, kind: input, shape index: {}]   ;;  %s880_s2 = inlined_call_operand.vmem [shape: f32[1,128], index: 2, kind: input, shape index: {}]   ;;  %s881_s3 = inlined_call_operand.vmem [shape: f32[1,128], index: 3, kind: input, shape index: {}]   ;;  %s882_s4 = inlined_call_operand.<no memory space> [shape: f32[1,1], index: 4, kind: input, shape index: {}]   ;;  %s883_s5 = inlined_call_operand.hbm [shape: f32[1,128], index: 5, kind: output, shape index: {}]  }
   0x1   :  { %v10_v0 = vstv %s882_s4 }
   0x2   :  { %11 = vst [vmem:[#allocation2] sm:$0x1] %v10_v0 }
   0x3   :  { %v586_v1 = vld [vmem:[%s879_s1] sm:$0x1f]   ;;  %vm87_vm0 = vcmask 1044480   ;;  %v25_v3 = vld [vmem:[%s878_s0 + $0x8] sm:$0xff]  ;;  %vm62_vm1 = vcmask 80896   ;;  %v26_v4 = vld [vmem:[%s878_s0 + $0x10] sm:$0xff] }
   0x4   :  { %v24_v2 = vld [vmem:[%s878_s0] sm:$0xff]  ;;  %580 = vmatprep.subr.msk.bf16.mxu0 %vm87_vm0, %v586_v1  ;;  %v89_v5 = vsel %vm87_vm0, %v586_v1, 0  ;;  %v27_v7 = vld [vmem:[%s878_s0 + $0x18] sm:$0xff]  ;;  %v29_v9 = vld [vmem:[%s878_s0 + $0x28] sm:$0xff]  ;;  %581 = vmatprep.subr.msk.bf16.mxu1 %vm87_vm0, %v586_v1 }
   0x5   :  { %v40_v6 = vpack.c.bf16 %v25_v3, %v24_v2  ;;  %v28_v8 = vld [vmem:[%s878_s0 + $0x20] sm:$0xff]  ;;  %561 = vmatpush3.bf16.msra.mxu0 %v89_v5  ;;  %v41_v10 = vpack.c.bf16 %v27_v7, %v26_v4  ;;  %579 = vmatpush3.bf16.msra.mxu1 %v89_v5  ;;  %v33_v13 = vld [vmem:[%s878_s0 + $0x48] sm:$0xff]  ;;  %v34_v14 = vld [vmem:[%s878_s0 + $0x50] sm:$0xff] }
   0x6   :  { %v42_v11 = vpack.c.bf16 %v29_v9, %v28_v8  ;;  %v32_v12 = vld [vmem:[%s878_s0 + $0x40] sm:$0xff]  ;;  %v35_v15 = vld [vmem:[%s878_s0 + $0x58] sm:$0xff]  ;;  %v37_v19 = vld [vmem:[%s878_s0 + $0x68] sm:$0xff] }
   0x7   :  { %562 = vmatprep.mubr.msk.bf16.mxu0 %vm62_vm1, %v40_v6  ;;  %v44_v16 = vpack.c.bf16 %v33_v13, %v32_v12  ;;  %v45_v17 = vpack.c.bf16 %v35_v15, %v34_v14  ;;  %v36_v18 = vld [vmem:[%s878_s0 + $0x60] sm:$0xff] }
   0x8   :  { %563 = vmatmul.mubr.msk.bf16.vlgmr.msra.gmra.mrb[0].mxu0 %vm62_vm1, %v41_v10  ;;  %v46_v20 = vpack.c.bf16 %v37_v19, %v36_v18 }
   0x9   :  { %12 = vsyncpa [#allocation4], 0  ;;  %566 = vmatprep.mubr.msk.bf16.mxu0 %vm62_vm1, %v42_v11  ;;  %v30_v21 = vld [vmem:[%s878_s0 + $0x30] sm:$0xff]  ;;  %v31_v22 = vld [vmem:[%s878_s0 + $0x38] sm:$0xff]  ;;  %570 = vmatprep.mubr.msk.bf16.mxu1 %vm62_vm1, %v44_v16  ;;  %v675_v27 = vmov 0   ;;  %vm408_vm2 = vcmask 130112  }
   0xa   :  { %571 = vmatmul.mubr.msk.bf16.vlgmr.msra.gmra.mrb[0].mxu1 %vm62_vm1, %v45_v17  ;;  %v38_v23 = vld [vmem:[%s878_s0 + $0x70] sm:$0xff]  ;;  %v39_v24 = vld [vmem:[%s878_s0 + $0x78] sm:$0xff]  ;;  %v43_v25 = vpack.c.bf16 %v31_v22, %v30_v21  ;;  %584 = vset.pattern.permute.xlu1 %v675_v27  ;;  %v772_v28 = vld [vmem:[%s880_s2] ss:$0 sm:$0xff]  ;;  %vm415_vm3 = vcmask 195712   ;;  %vm422_vm4 = vcmask 261312  }
   0xb   :  { %574 = vmatprep.mubr.msk.bf16.mxu1 %vm62_vm1, %v46_v20  ;;  %v47_v26 = vpack.c.bf16 %v39_v24, %v38_v23  ;;  %585 = vset.pattern.permute.xlu0 %v675_v27  ;;  %v779_v34 = vld [vmem:[%s881_s3] ss:$0 sm:$0xff]  ;;  %vm429_vm5 = vcmask 326912   ;;  %vm436_vm6 = vcmask 392512   ;;  %vm443_vm7 = vcmask 458112   ;;  %s676_s2 = smov [#allocation3]  }
   0xc   :  { %v259_v20 = vld [vmem:[#allocation2] sm:$0x1]  ;;  %vm450_vm8 = vcmask 523712   ;;  %vm457_vm9 = vcmask 589312   ;;  %vm464_vm10 = vcmask 654912   ;;  %vm471_vm11 = vcmask 720512  }
   0xd   :  { %vm478_vm12 = vcmask 786112   ;;  %vm485_vm13 = vcmask 851712   ;;  %vm492_vm14 = vcmask 917312   ;;  %vm499_vm15 = vcmask 982912   ;;  %s516_s3 = sshll.u32 %s676_s2, 4  ;;  %s517_s3 = int_to_ptr.vmem [resolvable:$true] %s516_s3 }
   0xe   :  { %vm506_vm0 = vcmask 1048512   ;;  %s651_s1 = scalar_lea.vmem %s517_s3, 16  ;;  %s655_s29 = scalar_lea.vmem %s517_s3, 32 }
   0xf   :  { %p652_p0 = scmp.ne.s32.totalorder %s517_s3, %s651_s1  ;;  %p656_p1 = scmp.lt.s32.totalorder %s517_s3, %s517_s3 }
  0x10   :  { %567 = vmatmul.mubr.msk.bf16.gmra.mrb[4].mxu0 %vm62_vm1, %v43_v25  ;;  %p657_p2 = scmp.lt.s32.totalorder %s655_s29, %s651_s1 }
  0x12   :  { %575 = vmatmul.mubr.msk.bf16.gmra.mrb[4].mxu1 %vm62_vm1, %v47_v26  ;;  %p658_p3 = por %p657_p2, %p656_p1 }
  0x14   :  { %p659_p4 = pnand %p658_p3, %p652_p0 }
  0xdb   :  { %v564_v29 = vpop.f32.mrb[0].mxu0 }
  0xdc   :  { %v134_v30 = vadd.f32 %v564_v29, %v772_v28  ;;  %v125_v31 = vpop.f32.mrb[1].mxu0 }
  0xdd   :  { %v126_v32 = vadd.f32 %v772_v28, %v125_v31  ;;  %v565_v33 = vpop.f32.mrb[2].mxu0  ;;  %v572_v35 = vpop.f32.mrb[0].mxu1 }
  0xde   :  { %v190_v36 = vmax.f32 %v134_v30, 0.0  ;;  %v137_v37 = vadd.f32 %v565_v33, %v772_v28  ;;  %v128_v38 = vpop.f32.mrb[3].mxu0  ;;  %v157_v39 = vpop.f32.mrb[1].mxu1  ;;  %v166_v12 = vadd.f32 %v572_v35, %v772_v28 }
  0xdf   :  { %v188_v40 = vmax.f32 %v126_v32, 0.0  ;;  %v129_v41 = vadd.f32 %v772_v28, %v128_v38  ;;  %v573_v42 = vpop.f32.mrb[2].mxu1  ;;  %v158_v6 = vadd.f32 %v772_v28, %v157_v39  ;;  %v265_v38 = vlaneseq }
  0xe0   :  { %v191_v43 = vmax.f32 %v137_v37, 0.0  ;;  %v213_v44 = vmul.f32 %v779_v34, %v190_v36  ;;  %v169_v45 = vadd.f32 %v573_v42, %v772_v28  ;;  %v160_v46 = vpop.f32.mrb[3].mxu1  ;;  %v198_v15 = vmax.f32 %v166_v12, 0.0 }
  0xe1   :  { %v189_v47 = vmax.f32 %v129_v41, 0.0  ;;  %v211_v48 = vmul.f32 %v779_v34, %v188_v40  ;;  %v196_v9 = vmax.f32 %v158_v6, 0.0  ;;  %v161_v10 = vadd.f32 %v772_v28, %v160_v46 }
  0xe2   :  { %231 = vadd.xlane.f32.xlu1 %v213_v44  ;;  %v199_v49 = vmax.f32 %v169_v45, 0.0  ;;  %v214_v53 = vmul.f32 %v779_v34, %v191_v43  ;;  %v221_v21 = vmul.f32 %v779_v34, %v198_v15  ;;  %v811_v40 = vshrl.u32 %v265_v38, 7 }
  0xe3   :  { %v568_v50 = vpop.f32.mrb[4].mxu0  ;;  %227 = vadd.xlane.f32.xlu0 %v211_v48  ;;  %v212_v57 = vmul.f32 %v779_v34, %v189_v47  ;;  %v197_v13 = vmax.f32 %v161_v10, 0.0  ;;  %v219_v14 = vmul.f32 %v779_v34, %v196_v9  ;;  %v827_v12 = vand.u32 127, %v265_v38 }
  0xe4   :  { %v150_v51 = vadd.f32 %v568_v50, %v772_v28  ;;  %v141_v52 = vpop.f32.mrb[5].mxu0  ;;  %v222_v54 = vmul.f32 %v779_v34, %v199_v49  ;;  %v267_v42 = vsub.s32 0, %v811_v40 }
  0xe5   :  { %v142_v55 = vadd.f32 %v772_v28, %v141_v52  ;;  %v569_v56 = vpop.f32.mrb[6].mxu0  ;;  %v576_v58 = vpop.f32.mrb[4].mxu1  ;;  %v220_v16 = vmul.f32 %v779_v34, %v197_v13 }
  0xe6   :  { %v194_v59 = vmax.f32 %v150_v51, 0.0  ;;  %233 = vadd.xlane.f32.xlu1 %v214_v53  ;;  %v144_v60 = vpop.f32.mrb[7].mxu0  ;;  %v173_v61 = vpop.f32.mrb[5].mxu1  ;;  %v153_v3 = vadd.f32 %v569_v56, %v772_v28  ;;  %v182_v18 = vadd.f32 %v576_v58, %v772_v28 }
  0xe7   :  { %v145_v62 = vadd.f32 %v772_v28, %v144_v60  ;;  %229 = vadd.xlane.f32.xlu0 %v212_v57  ;;  %v577_v63 = vpop.f32.mrb[6].mxu1  ;;  %v192_v2 = vmax.f32 %v142_v55, 0.0  ;;  %v174_v17 = vadd.f32 %v772_v28, %v173_v61 }
  0xe8   :  { %v217_v0 = vmul.f32 %v779_v34, %v194_v59  ;;  %v176_v1 = vpop.f32.mrb[7].mxu1  ;;  %v195_v7 = vmax.f32 %v153_v3, 0.0  ;;  %v202_v22 = vmax.f32 %v182_v18, 0.0  ;;  %v185_v25 = vadd.f32 %v577_v63, %v772_v28 }
  0xe9   :  { %v193_v4 = vmax.f32 %v145_v62, 0.0  ;;  %v215_v8 = vmul.f32 %v779_v34, %v192_v2  ;;  %v200_v19 = vmax.f32 %v174_v17, 0.0  ;;  %v177_v24 = vadd.f32 %v772_v28, %v176_v1 }
  0xea   :  { %v218_v11 = vmul.f32 %v779_v34, %v195_v7  ;;  %v225_v27 = vmul.f32 %v779_v34, %v202_v22  ;;  %v203_v29 = vmax.f32 %v185_v25, 0.0  ;;  %v403_v22 = vadd.s32 4294967288, %v827_v12 }
  0xeb   :  { %239 = vadd.xlane.f32.xlu0 %v217_v0  ;;  %v216_v5 = vmul.f32 %v779_v34, %v193_v4  ;;  %v223_v23 = vmul.f32 %v779_v34, %v200_v19  ;;  %v201_v26 = vmax.f32 %v177_v24, 0.0 }
  0xec   :  { %v226_v31 = vmul.f32 %v779_v34, %v203_v29 }
  0xed   :  { %237 = vadd.xlane.f32.xlu1 %v216_v5  ;;  %v224_v30 = vmul.f32 %v779_v34, %v201_v26 }
  0xef   :  { %235 = vadd.xlane.f32.xlu0 %v215_v8 }
  0xf3   :  { %241 = vadd.xlane.f32.xlu0 %v218_v11 }
  0xf7   :  { %243 = vadd.xlane.f32.xlu0 %v219_v14 }
  0xfb   :  { %245 = vadd.xlane.f32.xlu0 %v220_v16 }
  0xfe   :  { %262 = vperm.xlu1 %584, %v259_v20  }
  0xff   :  { %247 = vadd.xlane.f32.xlu0 %v221_v21 }
 0x103   :  { %251 = vadd.xlane.f32.xlu0 %v223_v23 }
 0x107   :  { %255 = vadd.xlane.f32.xlu0 %v225_v27 }
 0x10b   :  { %253 = vadd.xlane.f32.xlu0 %v224_v30  ;;  %v410_v30 = vadd.s32 4294967280, %v827_v12 }
 0x10f   :  { %257 = vadd.xlane.f32.xlu0 %v226_v31 }
 0x122   :  { %249 = vadd.xlane.f32.xlu1 %v222_v54 }
 0x16f   :  { %v232_v33 = vpop.xlane.xlu1 %231 }
 0x170   :  { %v228_v32 = vpop.xlane.xlu0 %227 }
 0x173   :  { %v234_v36 = vpop.xlane.xlu1 %233 }
 0x174   :  { %v230_v35 = vpop.xlane.xlu0 %229 }
 0x178   :  { %v240_v37 = vpop.xlane.xlu0 %239 }
 0x17a   :  { %v238_v28 = vpop.xlane.xlu1 %237 }
 0x17c   :  { %v236_v39 = vpop.xlane.xlu0 %235 }
 0x17e   :  { %v263_v43 = vpop.permute.xlu1 %262 }
 0x17f   :  { %v814_v45 = vrot.slane %v263_v43, %v267_v42  ;;  %v413_v42 = vsub.s32 %v410_v30, %v811_v40  ;;  %v417_v43 = vadd.s32 4294967272, %v827_v12 }
 0x180   :  { %v242_v41 = vpop.xlane.xlu0 %241 }
 0x181   :  { %v269_v46 = vadd.f32 %v814_v45, %v228_v32  ;;  %v270_v47 = vadd.f32 %v814_v45, %v230_v35  ;;  %v271_v48 = vadd.f32 %v814_v45, %v232_v33  ;;  %v272_v53 = vadd.f32 %v814_v45, %v234_v36 }
 0x182   :  { %v273_v55 = vadd.f32 %v814_v45, %v236_v39  ;;  %v274_v57 = vadd.f32 %v814_v45, %v238_v28  ;;  %v275_v58 = vadd.f32 %v814_v45, %v240_v37  ;;  %v276_v0 = vadd.f32 %v814_v45, %v242_v41 }
 0x183   :  { %v535_v49 = vmul.f32 -1.442695, %v269_v46  ;;  %v536_v50 = vmul.f32 -1.442695, %v270_v47  ;;  %v537_v52 = vmul.f32 -1.442695, %v271_v48  ;;  %v401_v33 = vsub.s32 %v827_v12, %v811_v40 }
 0x184   :  { %v244_v44 = vpop.xlane.xlu0 %243  ;;  %v538_v56 = vmul.f32 -1.442695, %v272_v53  ;;  %v539_v59 = vmul.f32 -1.442695, %v273_v55  ;;  %v540_v63 = vmul.f32 -1.442695, %v274_v57  ;;  %v406_v35 = vsub.s32 %v403_v22, %v811_v40 }
 0x185   :  { %587 = vpow2.f32 %v535_v49  ;;  %v541_v1 = vmul.f32 -1.442695, %v275_v58  ;;  %v277_v5 = vadd.f32 %v814_v45, %v244_v44  ;;  %v542_v6 = vmul.f32 -1.442695, %v276_v0 }
 0x186   :  { %589 = vpow2.f32 %v536_v50  ;;  %v424_v50 = vadd.s32 4294967264, %v827_v12 }
 0x187   :  { %591 = vpow2.f32 %v537_v52  ;;  %v543_v13 = vmul.f32 -1.442695, %v277_v5 }
 0x188   :  { %v246_v34 = vpop.xlane.xlu0 %245  ;;  %593 = vpow2.f32 %v538_v56  ;;  %v420_v56 = vsub.s32 %v417_v43, %v811_v40  ;;  %v427_v58 = vsub.s32 %v424_v50, %v811_v40 }
 0x189   :  { %595 = vpow2.f32 %v539_v59  ;;  %v278_v7 = vadd.f32 %v814_v45, %v246_v34  ;;  %v431_v59 = vadd.s32 4294967256, %v827_v12 }
 0x18a   :  { %597 = vpow2.f32 %v540_v63 }
 0x18b   :  { %599 = vpow2.f32 %v541_v1  ;;  %v544_v14 = vmul.f32 -1.442695, %v278_v7  ;;  %v434_v7 = vsub.s32 %v431_v59, %v811_v40 }
 0x18c   :  { %v248_v51 = vpop.xlane.xlu0 %247 }
 0x18d   :  { %v279_v9 = vadd.f32 %v814_v45, %v248_v51 }
 0x18f   :  { %v588_v60 = vpop.eup %587  ;;  %v545_v16 = vmul.f32 -1.442695, %v279_v9 }
 0x190   :  { %v252_v54 = vpop.xlane.xlu0 %251  ;;  %v590_v62 = vpop.eup %589  ;;  %v333_v2 = vadd.f32 1.0, %v588_v60 }
 0x191   :  { %v592_v3 = vpop.eup %591  ;;  %v334_v4 = vadd.f32 1.0, %v590_v62  ;;  %v281_v15 = vadd.f32 %v814_v45, %v252_v54 }
 0x192   :  { %v335_v10 = vadd.f32 1.0, %v592_v3  ;;  %601 = vrcp.f32 %v333_v2  ;;  %v594_v11 = vpop.eup %593  ;;  %v445_v3 = vadd.s32 4294967240, %v827_v12 }
 0x193   :  { %603 = vrcp.f32 %v334_v4  ;;  %v596_v17 = vpop.eup %595  ;;  %v336_v20 = vadd.f32 1.0, %v594_v11  ;;  %v547_v23 = vmul.f32 -1.442695, %v281_v15  ;;  %v438_v4 = vadd.s32 4294967248, %v827_v12 }
 0x194   :  { %v256_v61 = vpop.xlane.xlu0 %255  ;;  %605 = vpow2.f32 %v542_v6  ;;  %v598_v24 = vpop.eup %597  ;;  %v337_v26 = vadd.f32 1.0, %v596_v17 }
 0x195   :  { %607 = vrcp.f32 %v335_v10  ;;  %v283_v21 = vadd.f32 %v814_v45, %v256_v61  ;;  %v600_v27 = vpop.eup %599  ;;  %v338_v37 = vadd.f32 1.0, %v598_v24  ;;  %v459_v24 = vadd.s32 4294967224, %v827_v12 }
 0x196   :  { %609 = vpow2.f32 %v543_v13  ;;  %v339_v41 = vadd.f32 1.0, %v600_v27  ;;  %v466_v27 = vadd.s32 4294967216, %v827_v12 }
 0x197   :  { %611 = vpow2.f32 %v544_v14  ;;  %v549_v32 = vmul.f32 -1.442695, %v283_v21  ;;  %v452_v21 = vadd.s32 4294967232, %v827_v12 }
 0x198   :  { %v254_v8 = vpop.xlane.xlu0 %253  ;;  %613 = vpow2.f32 %v545_v16  ;;  %v441_v16 = vsub.s32 %v438_v4, %v811_v40 }
 0x199   :  { %v282_v18 = vadd.f32 %v814_v45, %v254_v8  ;;  %615 = vrcp.f32 %v336_v20  ;;  %v455_v30 = vsub.s32 %v452_v21, %v811_v40 }
 0x19a   :  { %617 = vpow2.f32 %v547_v23 }
 0x19b   :  { %v548_v29 = vmul.f32 -1.442695, %v282_v18  ;;  %619 = vrcp.f32 %v337_v26  ;;  %v448_v18 = vsub.s32 %v445_v3, %v811_v40 }
 0x19c   :  { %v258_v19 = vpop.xlane.xlu0 %257  ;;  %v602_v31 = vpop.eup %601 }
 0x19d   :  { %v284_v25 = vadd.f32 %v814_v45, %v258_v19  ;;  %v604_v36 = vpop.eup %603  ;;  %621 = vpow2.f32 %v548_v29  ;;  %v402_v46 = vrot.slane %v602_v31, %v401_v33 }
 0x19e   :  { %v606_v28 = vpop.eup %605  ;;  %623 = vpow2.f32 %v549_v32  ;;  %v407_v47 = vrot.slane %v604_v36, %v406_v35  ;;  %v462_v35 = vsub.s32 %v459_v24, %v811_v40  ;;  %v473_v36 = vadd.s32 4294967208, %v827_v12 }
 0x19f   :  { %v550_v38 = vmul.f32 -1.442695, %v284_v25  ;;  %v608_v44 = vpop.eup %607  ;;  %625 = vrcp.f32 %v338_v37  ;;  %v340_v52 = vadd.f32 1.0, %v606_v28  ;;  %v480_v28 = vadd.s32 4294967200, %v827_v12 }
 0x1a0   :  { %v610_v48 = vpop.eup %609  ;;  %v414_v53 = vrot.slane %v608_v44, %v413_v42  ;;  %v409_v55 = vsel %vm408_vm2, %v407_v47, %v402_v46  ;;  %v487_v42 = vadd.s32 4294967192, %v827_v12  ;;  %v494_v44 = vadd.s32 4294967184, %v827_v12 }
 0x1a1   :  { %627 = vpow2.f32 %v550_v38  ;;  %v612_v51 = vpop.eup %611  ;;  %v341_v57 = vadd.f32 1.0, %v610_v48  ;;  %v469_v38 = vsub.s32 %v466_v27, %v811_v40  ;;  %v476_v46 = vsub.s32 %v473_v36, %v811_v40 }
 0x1a2   :  { %629 = vrcp.f32 %v339_v41  ;;  %v614_v54 = vpop.eup %613  ;;  %v342_v61 = vadd.f32 1.0, %v612_v51  ;;  %v416_v62 = vsel %vm415_vm3, %v414_v53, %v409_v55  ;;  %v501_v47 = vadd.s32 4294967176, %v827_v12 }
 0x1a3   :  { %v343_v0 = vadd.f32 1.0, %v614_v54  ;;  %v483_v51 = vsub.s32 %v480_v28, %v811_v40  ;;  %v490_v53 = vsub.s32 %v487_v42, %v811_v40  ;;  %v497_v55 = vsub.s32 %v494_v44, %v811_v40 }
 0x1a4   :  { %v504_v12 = vsub.s32 %v501_v47, %v811_v40 }
 0x1af   :  { %v250_v39 = vpop.xlane.xlu1 %249 }
 0x1b0   :  { %v280_v34 = vadd.f32 %v814_v45, %v250_v39  ;;  %v616_v45 = vpop.eup %615 }
 0x1b1   :  { %v618_v60 = vpop.eup %617  ;;  %v421_v1 = vrot.slane %v616_v45, %v420_v56 }
 0x1b2   :  { %v546_v49 = vmul.f32 -1.442695, %v280_v34  ;;  %v620_v63 = vpop.eup %619  ;;  %v345_v9 = vadd.f32 1.0, %v618_v60 }
 0x1b3   :  { %v622_v2 = vpop.eup %621  ;;  %v423_v6 = vsel %vm422_vm4, %v421_v1, %v416_v62  ;;  %v428_v10 = vrot.slane %v620_v63, %v427_v58 }
 0x1b4   :  { %631 = vpow2.f32 %v546_v49  ;;  %v624_v5 = vpop.eup %623  ;;  %v346_v13 = vadd.f32 1.0, %v622_v2 }
 0x1b5   :  { %633 = vrcp.f32 %v340_v52  ;;  %v626_v8 = vpop.eup %625  ;;  %v430_v15 = vsel %vm429_vm5, %v428_v10, %v423_v6  ;;  %v347_v19 = vadd.f32 1.0, %v624_v5 }
 0x1b6   :  { %635 = vrcp.f32 %v341_v57  ;;  %v628_v11 = vpop.eup %627  ;;  %v435_v20 = vrot.slane %v626_v8, %v434_v7 }
 0x1b7   :  { %637 = vrcp.f32 %v342_v61  ;;  %v630_v14 = vpop.eup %629  ;;  %v348_v22 = vadd.f32 1.0, %v628_v11 }
 0x1b8   :  { %639 = vrcp.f32 %v343_v0  ;;  %v437_v25 = vsel %vm436_vm6, %v435_v20, %v430_v15  ;;  %v442_v29 = vrot.slane %v630_v14, %v441_v16 }
 0x1b9   :  { %641 = vrcp.f32 %v345_v9 }
 0x1ba   :  { %643 = vrcp.f32 %v346_v13  ;;  %v444_v31 = vsel %vm443_vm7, %v442_v29, %v437_v25 }
 0x1be   :  { %v632_v17 = vpop.eup %631 }
 0x1bf   :  { %v344_v23 = vadd.f32 1.0, %v632_v17  ;;  %v634_v26 = vpop.eup %633 }
 0x1c0   :  { %v636_v32 = vpop.eup %635  ;;  %v449_v33 = vrot.slane %v634_v26, %v448_v18 }
 0x1c1   :  { %645 = vrcp.f32 %v344_v23  ;;  %v638_v37 = vpop.eup %637  ;;  %v456_v43 = vrot.slane %v636_v32, %v455_v30 }
 0x1c2   :  { %647 = vrcp.f32 %v347_v19  ;;  %v640_v39 = vpop.eup %639  ;;  %v451_v41 = vsel %vm450_vm8, %v449_v33, %v444_v31  ;;  %v463_v34 = vrot.slane %v638_v37, %v462_v35 }
 0x1c3   :  { %649 = vrcp.f32 %v348_v22  ;;  %v642_v48 = vpop.eup %641  ;;  %v470_v49 = vrot.slane %v640_v39, %v469_v38  ;;  %v458_v50 = vsel %vm457_vm9, %v456_v43, %v451_v41 }
 0x1c4   :  { %v644_v52 = vpop.eup %643  ;;  %v465_v45 = vsel %vm464_vm10, %v463_v34, %v458_v50  ;;  %v484_v60 = vrot.slane %v642_v48, %v483_v51 }
 0x1c5   :  { %v472_v59 = vsel %vm471_vm11, %v470_v49, %v465_v45  ;;  %v491_v62 = vrot.slane %v644_v52, %v490_v53 }
 0x1cb   :  { %v646_v54 = vpop.eup %645 }
 0x1cc   :  { %v648_v56 = vpop.eup %647  ;;  %v477_v57 = vrot.slane %v646_v54, %v476_v46 }
 0x1cd   :  { %v650_v58 = vpop.eup %649  ;;  %v498_v0 = vrot.slane %v648_v56, %v497_v55 }
 0x1ce   :  { %v479_v61 = vsel %vm478_vm12, %v477_v57, %v472_v59  ;;  %v505_v2 = vrot.slane %v650_v58, %v504_v12 }
 0x1cf   :  { %v486_v63 = vsel %vm485_vm13, %v484_v60, %v479_v61 }
 0x1d0   :  { %v493_v1 = vsel %vm492_vm14, %v491_v62, %v486_v63 }
 0x1d1   :  { %v500_v3 = vsel %vm499_vm15, %v498_v0, %v493_v1 }
 0x1d2   :  { %v507_v4 = vsel %vm506_vm0, %v505_v2, %v500_v3 }
 0x1d3   :  { %509 = vst [vmem:[#allocation3] sm:$0x1] %v507_v4 }
 0x1d4   :  { %662 = shalt.err (!%p659_p4)
}
 0x1d5   :  { %s663_s7 = scalar_lea.hbm %s883_s5, 16 }
 0x1d6   :  { %p664_p5 = scmp.ne.s32.totalorder %s883_s5, %s663_s7  ;;  %p667_p6 = scmp.lt.u32.totalorder %s663_s7, %s883_s5 }
 0x1d8   :  { %p669_p7 = pnand %p667_p6, %p664_p5 }
 0x1da   :  { %672 = shalt.err (!%p669_p7)
}
 0x1db   :  { %519 = dma.vmem_to_hbm [thread:$0]  %s517_s3, 16, %s883_s5, [#allocation4]  }
 0x1dc   :  { %673 = dma.done.wait [#allocation4], 16  }
 0x1dd   :  { %674 = vsyncadd [#allocation4], 4294967280 }
 0x1de   :  { %523 = vsyncpa [#allocation4], 1 }

</bundles_post_ra>
